<compile_context>
chip_gen: v6e
topology: v6e:2x2x1
jax: 0.10.0
libtpu: 0.0.40
codegen_flags: <defaults>
</compile_context>

<pallas_src>
import jax
import jax.numpy as jnp
from jax.experimental import pallas as pl
from jax.experimental.pallas import tpu as pltpu

TB_MAX = 8192  # batch tile (lanes); multiple of 128


def mlp_kernel(x_ref,
               w12_ref, b12_ref,
               w3_ref, b3_ref,
               w4_ref, b4_ref,
               o_ref):
    x = x_ref[...]                                     # (1, TB) -- batch on lanes

    # Fused Dense1+Dense2 (no ReLU between them in the original module):
    # VPU outer product (32,1)*(1,TB) + bias, then ReLU.
    h = jnp.maximum(w12_ref[...] * x + b12_ref[...], 0.0)          # (32, TB)

    # Dense3 (16x32) on the MXU + bias + ReLU.
    h = jnp.dot(w3_ref[...], h, preferred_element_type=jnp.float32) + b3_ref[...]
    h = jnp.maximum(h, 0.0)                                         # (16, TB)

    # Dense4 (1x16) on the MXU + scalar bias -> lane-dense (1, TB) output.
    out = jnp.dot(w4_ref[...], h, preferred_element_type=jnp.float32) + b4_ref[...]
    o_ref[...] = out.astype(o_ref.dtype)


def fuse_params(p):
    """Algebraic Dense1+Dense2 fusion (exact up to f32 rounding)."""
    w12 = p["w2"] @ p["w1"]                 # (32, 1)
    b12 = p["w2"] @ p["b1"] + p["b2"]       # (32, 1)
    return {"w12": w12, "b12": b12,
            "w3": p["w3"], "b3": p["b3"],   # (16,32), (16,1)
            "w4": p["w4"], "b4": p["b4"]}   # (1,16),  (1,1)


def non_lr_forward(x, fp, *, tb_max=TB_MAX):
    """x: (B, 1) float32 (PyTorch layout). Returns (B, 1)."""
    B = x.shape[0]
    xt = x.reshape(1, B)                    # batch onto the lane axis

    # Pad only to the 128-lane granularity, and only when needed.
    Bp = pl.cdiv(B, 128) * 128
    if Bp != B:
        xt = jnp.pad(xt, ((0, 0), (0, Bp - B)))

    tb = min(tb_max, Bp)                    # tile is a multiple of 128
    grid = (pl.cdiv(Bp, tb),)

    # Small weights/biases: full-array blocks with constant index_map
    # -> fetched once, resident across all grid steps.
    const = lambda a: pl.BlockSpec(a.shape, lambda i: (0, 0))

    out_t = pl.pallas_call(
        mlp_kernel,
        out_shape=jax.ShapeDtypeStruct((1, Bp), x.dtype),
        grid=grid,
        in_specs=[
            pl.BlockSpec((1, tb), lambda i: (0, i)),   # x tile (lane-dense)
            const(fp["w12"]), const(fp["b12"]),
            const(fp["w3"]), const(fp["b3"]),
            const(fp["w4"]), const(fp["b4"]),
        ],
        out_specs=pl.BlockSpec((1, tb), lambda i: (0, i)),  # lane-dense output
        compiler_params=pltpu.CompilerParams(
            dimension_semantics=("parallel",),          # 2-TC sharding on v7x
            vmem_limit_bytes=32 * 1024 * 1024,
        ),
    )(xt, fp["w12"], fp["b12"], fp["w3"], fp["b3"], fp["w4"], fp["b4"])

    if Bp != B:
        out_t = out_t[:, :B]
    return out_t.reshape(B, 1)


def init_params(key):
    """torch.nn.Linear-style init (uniform +/- 1/sqrt(fan_in)).
    Weights stored (out_features, in_features); biases as (out_features, 1)."""
    dims = [(32, 1), (32, 32), (16, 32), (1, 16)]  # (out, in)
    params = {}
    for i, (fan_out, fan_in) in enumerate(dims, start=1):
        key, kw, kb = jax.random.split(key, 3)
        bound = 1.0 / jnp.sqrt(jnp.float32(fan_in))
        params[f"w{i}"] = jax.random.uniform(kw, (fan_out, fan_in), jnp.float32,
                                             minval=-bound, maxval=bound)
        params[f"b{i}"] = jax.random.uniform(kb, (fan_out, 1), jnp.float32,
                                             minval=-bound, maxval=bound)
    return params


def reference_forward(x, p):
    """Pure-JAX reference matching the PyTorch module semantics."""
    h = x @ p["w1"].T + p["b1"].T
    h = jnp.maximum(h @ p["w2"].T + p["b2"].T, 0.0)
    h = jnp.maximum(h @ p["w3"].T + p["b3"].T, 0.0)
    return h @ p["w4"].T + p["b4"].T


if __name__ == "__main__":
    key = jax.random.PRNGKey(0)
    key, kp = jax.random.split(key)
    params = init_params(kp)
    fparams = fuse_params(params)

    ATOL, RTOL = 5e-5, 1e-5

    # Small case (pad-to-128 path, single grid step).
    key, kx = jax.random.split(key)
    x_small = jax.random.normal(kx, (8, 1), jnp.float32)
    out_small = jax.block_until_ready(non_lr_forward(x_small, fparams))
    assert out_small.shape == (8, 1), out_small.shape
    assert jnp.allclose(out_small, reference_forward(x_small, params),
                        atol=ATOL, rtol=RTOL)

    # Non-multiple-of-128 batch (pad/slice path), still one grid step.
    key, kx2 = jax.random.split(key)
    x_mid = jax.random.normal(kx2, (300, 1), jnp.float32)
    out_mid = jax.block_until_ready(non_lr_forward(x_mid, fparams))
    assert out_mid.shape == (300, 1), out_mid.shape
    assert jnp.allclose(out_mid, reference_forward(x_mid, params),
                        atol=ATOL, rtol=RTOL)

    # Large batch: no padding, multi-step grid (exercises pipelining and
    # "parallel" grid sharding across TensorCores).
    key, kx3 = jax.random.split(key)
    x_big = jax.random.normal(kx3, (2 * TB_MAX, 1), jnp.float32)
    out_big = jax.block_until_ready(non_lr_forward(x_big, fparams))
    assert out_big.shape == (2 * TB_MAX, 1), out_big.shape
    assert jnp.allclose(out_big, reference_forward(x_big, params),
                        atol=ATOL, rtol=RTOL)

    print("KERNEL_OK")
</pallas_src>

<mosaic_0001>
module attributes {stable_mosaic.version = 11 : i64} {
  func.func @mlp_kernel(%arg0: i32, %arg1: memref<1x128xf32, #tpu.memory_space<vmem>>, %arg2: memref<32x1xf32, #tpu.memory_space<vmem>>, %arg3: memref<32x1xf32, #tpu.memory_space<vmem>>, %arg4: memref<16x32xf32, #tpu.memory_space<vmem>>, %arg5: memref<16x1xf32, #tpu.memory_space<vmem>>, %arg6: memref<1x16xf32, #tpu.memory_space<vmem>>, %arg7: memref<1x1xf32, #tpu.memory_space<vmem>>, %arg8: memref<1x128xf32, #tpu.memory_space<vmem>>) attributes {dimension_semantics = [#tpu.dimension_semantics<parallel>], iteration_bounds = array<i64: 1>, scalar_prefetch = 0 : i64, scratch_operands = 0 : i64, tpu.core_type = #tpu.core_type<tc>, window_params = [{transform_indices = @transform_0, window_bounds = array<i64: 1, 128>}, {pipeline_mode = #tpu.pipeline_mode<synchronous>, transform_indices = @transform_1, window_bounds = array<i64: 32, 1>}, {pipeline_mode = #tpu.pipeline_mode<synchronous>, transform_indices = @transform_2, window_bounds = array<i64: 32, 1>}, {pipeline_mode = #tpu.pipeline_mode<synchronous>, transform_indices = @transform_3, window_bounds = array<i64: 16, 32>}, {pipeline_mode = #tpu.pipeline_mode<synchronous>, transform_indices = @transform_4, window_bounds = array<i64: 16, 1>}, {pipeline_mode = #tpu.pipeline_mode<synchronous>, transform_indices = @transform_5, window_bounds = array<i64: 1, 16>}, {pipeline_mode = #tpu.pipeline_mode<synchronous>, transform_indices = @transform_6, window_bounds = array<i64: 1, 1>}, {transform_indices = @transform_7, window_bounds = array<i64: 1, 128>}]} {
    %c0 = arith.constant 0 : index
    %c0_0 = arith.constant 0 : index
    %0 = vector.load %arg1[%c0, %c0_0] : memref<1x128xf32, #tpu.memory_space<vmem>>, vector<1x128xf32>
    %c0_1 = arith.constant 0 : index
    %c0_2 = arith.constant 0 : index
    %1 = vector.load %arg2[%c0_1, %c0_2] : memref<32x1xf32, #tpu.memory_space<vmem>>, vector<32x1xf32>
    %2 = vector.broadcast %1 : vector<32x1xf32> to vector<32x128xf32>
    %3 = vector.broadcast %0 : vector<1x128xf32> to vector<32x128xf32>
    %4 = arith.mulf %2, %3 : vector<32x128xf32>
    %c0_3 = arith.constant 0 : index
    %c0_4 = arith.constant 0 : index
    %5 = vector.load %arg3[%c0_3, %c0_4] : memref<32x1xf32, #tpu.memory_space<vmem>>, vector<32x1xf32>
    %6 = vector.broadcast %5 : vector<32x1xf32> to vector<32x128xf32>
    %7 = arith.addf %4, %6 : vector<32x128xf32>
    %cst = arith.constant 0.000000e+00 : f32
    %8 = vector.broadcast %cst : f32 to vector<32x128xf32>
    %9 = arith.maximumf %7, %8 : vector<32x128xf32>
    %c0_5 = arith.constant 0 : index
    %c0_6 = arith.constant 0 : index
    %10 = vector.load %arg4[%c0_5, %c0_6] : memref<16x32xf32, #tpu.memory_space<vmem>>, vector<16x32xf32>
    %cst_7 = arith.constant dense<0.000000e+00> : vector<16x128xf32>
    %11 = tpu.matmul %10, %9, %cst_7 {dimension_numbers = #tpu.dot_dimension_numbers<[1], [0], [0], [1], [0, 0, 1, 1], [], []>} : vector<16x32xf32>, vector<32x128xf32>, vector<16x128xf32> -> vector<16x128xf32>
    %c0_8 = arith.constant 0 : index
    %c0_9 = arith.constant 0 : index
    %12 = vector.load %arg5[%c0_8, %c0_9] : memref<16x1xf32, #tpu.memory_space<vmem>>, vector<16x1xf32>
    %13 = vector.broadcast %12 : vector<16x1xf32> to vector<16x128xf32>
    %14 = arith.addf %11, %13 : vector<16x128xf32>
    %cst_10 = arith.constant 0.000000e+00 : f32
    %15 = vector.broadcast %cst_10 : f32 to vector<16x128xf32>
    %16 = arith.maximumf %14, %15 : vector<16x128xf32>
    %c0_11 = arith.constant 0 : index
    %c0_12 = arith.constant 0 : index
    %17 = vector.load %arg6[%c0_11, %c0_12] : memref<1x16xf32, #tpu.memory_space<vmem>>, vector<1x16xf32>
    %cst_13 = arith.constant dense<0.000000e+00> : vector<1x128xf32>
    %18 = tpu.matmul %17, %16, %cst_13 {dimension_numbers = #tpu.dot_dimension_numbers<[1], [0], [0], [1], [0, 0, 1, 1], [], []>} : vector<1x16xf32>, vector<16x128xf32>, vector<1x128xf32> -> vector<1x128xf32>
    %c0_14 = arith.constant 0 : index
    %c0_15 = arith.constant 0 : index
    %19 = vector.load %arg7[%c0_14, %c0_15] : memref<1x1xf32, #tpu.memory_space<vmem>>, vector<1x1xf32>
    %20 = vector.broadcast %19 : vector<1x1xf32> to vector<1x128xf32>
    %21 = arith.addf %18, %20 : vector<1x128xf32>
    %c0_16 = arith.constant 0 : index
    %c0_17 = arith.constant 0 : index
    %22 = vector.load %arg8[%c0_16, %c0_17] : memref<1x128xf32, #tpu.memory_space<vmem>>, vector<1x128xf32>
    tpu.vector_store %arg8[%c0_16, %c0_17], %21 {strides = array<i32>} : memref<1x128xf32, #tpu.memory_space<vmem>>, vector<1x128xf32>,
    return
  }
  func.func @transform_0(%arg0: i32) -> (i32, i32) {
    %c0_i32 = arith.constant 0 : i32
    %c0_i32_0 = arith.constant 0 : i32
    return %c0_i32, %arg0 : i32, i32
  }
  func.func @transform_1(%arg0: i32) -> (i32, i32) {
    %c0_i32 = arith.constant 0 : i32
    %c0_i32_0 = arith.constant 0 : i32
    %c0_i32_1 = arith.constant 0 : i32
    return %c0_i32, %c0_i32_0 : i32, i32
  }
  func.func @transform_2(%arg0: i32) -> (i32, i32) {
    %c0_i32 = arith.constant 0 : i32
    %c0_i32_0 = arith.constant 0 : i32
    %c0_i32_1 = arith.constant 0 : i32
    return %c0_i32, %c0_i32_0 : i32, i32
  }
  func.func @transform_3(%arg0: i32) -> (i32, i32) {
    %c0_i32 = arith.constant 0 : i32
    %c0_i32_0 = arith.constant 0 : i32
    %c0_i32_1 = arith.constant 0 : i32
    return %c0_i32, %c0_i32_0 : i32, i32
  }
  func.func @transform_4(%arg0: i32) -> (i32, i32) {
    %c0_i32 = arith.constant 0 : i32
    %c0_i32_0 = arith.constant 0 : i32
    %c0_i32_1 = arith.constant 0 : i32
    return %c0_i32, %c0_i32_0 : i32, i32
  }
  func.func @transform_5(%arg0: i32) -> (i32, i32) {
    %c0_i32 = arith.constant 0 : i32
    %c0_i32_0 = arith.constant 0 : i32
    %c0_i32_1 = arith.constant 0 : i32
    return %c0_i32, %c0_i32_0 : i32, i32
  }
  func.func @transform_6(%arg0: i32) -> (i32, i32) {
    %c0_i32 = arith.constant 0 : i32
    %c0_i32_0 = arith.constant 0 : i32
    %c0_i32_1 = arith.constant 0 : i32
    return %c0_i32, %c0_i32_0 : i32, i32
  }
  func.func @transform_7(%arg0: i32) -> (i32, i32) {
    %c0_i32 = arith.constant 0 : i32
    %c0_i32_0 = arith.constant 0 : i32
    return %c0_i32, %arg0 : i32, i32
  }
}

</mosaic_0001>

<bundles_post_ra>
// kernel: tpu_custom_call.1
= control target key start
LH: loop header
LB: loop body
LE: loop exit
PB: predicated region body
PF: predicated region fallthrough
CT: control target
= control target key end

     0   :  { %s447_s0 = inlined_call_operand.vmem [shape: f32[1,128], index: 0, kind: input, shape index: {}]   ;;  %s448_s1 = inlined_call_operand.vmem [shape: f32[32,1], index: 1, kind: input, shape index: {}]   ;;  %s449_s2 = inlined_call_operand.vmem [shape: f32[32,1], index: 2, kind: input, shape index: {}]   ;;  %s450_s3 = inlined_call_operand.vmem [shape: f32[16,32], index: 3, kind: input, shape index: {}]   ;;  %s451_s4 = inlined_call_operand.vmem [shape: f32[16,1], index: 4, kind: input, shape index: {}]   ;;  %s452_s5 = inlined_call_operand.vmem [shape: f32[1,16], index: 5, kind: input, shape index: {}]   ;;  %s453_s6 = inlined_call_operand.<no memory space> [shape: f32[1,1], index: 6, kind: input, shape index: {}]   ;;  %s454_s7 = inlined_call_operand.hbm [shape: f32[1,128], index: 7, kind: output, shape index: {}]  }
   0x1   :  { %v12_v0 = vstv %s453_s6 }
   0x2   :  { %13 = vst [vmem:[#allocation2] sm:$0x1] %v12_v0 }
   0x3   :  { %v67_v1 = vld [vmem:[%s449_s2 + $0x18] sm:$0xff]  ;;  %v353_v3 = vmov 0   ;;  %v32_v4 = vld [vmem:[%s448_s1 + $0x10] sm:$0xff]  ;;  %v31_v5 = vld [vmem:[%s448_s1 + $0x8] sm:$0xff] }
   0x4   :  { %v33_v2 = vld [vmem:[%s448_s1 + $0x18] sm:$0xff]  ;;  %330 = vset.pattern.permute.xlu1 %v353_v3  ;;  %329 = vset.pattern.permute.xlu0 %v353_v3 }
   0x5   :  { %85 = vperm.xlu1 %330, %v67_v1   ;;  %51 = vperm.xlu0 %329, %v33_v2  }
   0x6   :  { %14 = vsyncpa [#allocation4], 0  ;;  %v66_v6 = vld [vmem:[%s449_s2 + $0x10] sm:$0xff]  ;;  %v30_v7 = vld [vmem:[%s448_s1] sm:$0xff]  ;;  %vm110_vm0 = vcmask 261120   ;;  %v354_v36 = vmov 0.0   ;;  %v201_v46 = vlaneseq }
   0x7   :  { %v65_v8 = vld [vmem:[%s449_s2 + $0x8] sm:$0xff]  ;;  %v64_v9 = vld [vmem:[%s449_s2] sm:$0xff]  ;;  %318 = vmatprep.subr.mxu1 %v354_v36  ;;  %vm355_vm1 = vmmov 0   ;;  %vm205_vm2 = vcmask 130048  }
   0x8   :  { %v99_v10 = vld [vmem:[%s451_s4 + $0x8] sm:$0xff]  ;;  %v98_v11 = vld [vmem:[%s451_s4] sm:$0xff]  ;;  %322 = vmatprep.mubr.msk.f32.mxu1 %vm355_vm1, %v354_v36  ;;  %v202_v47 = vshrl.u32 %v201_v46, 7 }
   0x9   :  { %46 = vperm.xlu0 %329, %v32_v4   ;;  %41 = vperm.xlu1 %330, %v31_v5   ;;  %v96_v12 = vld [vmem:[%s450_s3] sm:$0xff]  ;;  %v97_v35 = vld [vmem:[%s450_s3 + $0x8] sm:$0xff]  ;;  %s356_s3 = smov [#allocation3]  }
   0xa   :  { %315 = vmatprep.mubr.msk.f32.mxu0 %vm110_vm0, %v96_v12  ;;  %v195_v13 = vld [vmem:[#allocation2] sm:$0x1]  ;;  %v203_v48 = vsub.s32 0, %v202_v47  ;;  %s286_s26 = sshll.u32 %s356_s3, 4  ;;  %s287_s26 = int_to_ptr.vmem [resolvable:$true] %s286_s26 }
   0xb   :  { %v294_v14 = vld [vmem:[%s447_s0] ss:$0 sm:$0xff]  ;;  %s331_s27 = scalar_lea.vmem %s287_s26, 16  ;;  %s335_s28 = scalar_lea.vmem %s287_s26, 32 }
   0xc   :  { %v194_v45 = vld [vmem:[%s452_s5] sm:$0x1]  ;;  %p332_p0 = scmp.ne.s32.totalorder %s287_s26, %s331_s27  ;;  %p336_p1 = scmp.lt.s32.totalorder %s287_s26, %s287_s26 }
   0xd   :  { %80 = vperm.xlu0 %329, %v66_v6   ;;  %36 = vperm.xlu1 %330, %v30_v7   ;;  %p337_p2 = scmp.lt.s32.totalorder %s335_s28, %s331_s27 }
   0xf   :  { %p338_p3 = por %p337_p2, %p336_p1 }
  0x11   :  { %75 = vperm.xlu0 %329, %v65_v8   ;;  %70 = vperm.xlu1 %330, %v64_v9   ;;  %p339_p4 = pnand %p338_p3, %p332_p0 }
  0x15   :  { %107 = vperm.xlu0 %329, %v99_v10   ;;  %102 = vperm.xlu1 %330, %v98_v11  }
  0x19   :  { %198 = vperm.xlu0 %329, %v195_v13  }
  0x80   :  { %v86_v15 = vpop.permute.xlu1 %85  ;;  %v52_v16 = vpop.permute.xlu0 %51 }
  0x81   :  { %v63_v17 = vmul.f32 %v294_v14, %v52_v16 }
  0x83   :  { %v91_v18 = vadd.f32 %v86_v15, %v63_v17 }
  0x84   :  { %v47_v19 = vpop.permute.xlu0 %46  ;;  %v42_v20 = vpop.permute.xlu1 %41 }
  0x85   :  { %v95_v21 = vmax.f32 %v91_v18, 0.0  ;;  %v62_v22 = vmul.f32 %v294_v14, %v47_v19  ;;  %v61_v26 = vmul.f32 %v294_v14, %v42_v20 }
  0x87   :  { %307 = vmatprep.subr.mxu0 %v95_v21 }
  0x88   :  { %v81_v23 = vpop.permute.xlu0 %80  ;;  %v37_v24 = vpop.permute.xlu1 %36  ;;  %308 = vmatpush3.msra.mxu0 %v95_v21 }
  0x89   :  { %v90_v25 = vadd.f32 %v81_v23, %v62_v22  ;;  %v60_v28 = vmul.f32 %v294_v14, %v37_v24 }
  0x8b   :  { %v94_v27 = vmax.f32 %v90_v25, 0.0 }
  0x8c   :  { %v76_v29 = vpop.permute.xlu0 %75  ;;  %v71_v30 = vpop.permute.xlu1 %70 }
  0x8d   :  { %v89_v31 = vadd.f32 %v76_v29, %v61_v26  ;;  %v88_v32 = vadd.f32 %v71_v30, %v60_v28  ;;  %309 = vmatprep.subr.mxu0 %v94_v27 }
  0x8e   :  { %310 = vmatpush3.msra.mxu0 %v94_v27 }
  0x8f   :  { %v93_v33 = vmax.f32 %v89_v31, 0.0  ;;  %v92_v34 = vmax.f32 %v88_v32, 0.0 }
  0x90   :  { %v108_v37 = vpop.permute.xlu0 %107  ;;  %v103_v40 = vpop.permute.xlu1 %102 }
  0x91   :  { %311 = vmatprep.subr.mxu0 %v93_v33 }
  0x92   :  { %312 = vmatpush3.msra.mxu0 %v93_v33 }
  0x93   :  { %313 = vmatprep.subr.mxu0 %v92_v34 }
  0x94   :  { %314 = vmatpush3.msra.mxu0 %v92_v34  ;;  %v199_v49 = vpop.permute.xlu0 %198 }
  0x95   :  { %316 = vmatmul.mubr.msk.f32.vlgmr.msra.gmra.mxu0 %vm110_vm0, %v97_v35  ;;  %v204_v50 = vrot.slane %v199_v49, %v203_v48 }
 0x155   :  { %v317_v38 = vpop.f32.mrf.mxu0 }
 0x156   :  { %v189_v39 = vadd.f32 %v317_v38, %v108_v37 }
 0x157   :  { %v183_v41 = vpop.f32.mrf.mxu0 }
 0x158   :  { %v193_v42 = vmax.f32 %v189_v39, 0.0  ;;  %v184_v43 = vadd.f32 %v183_v41, %v103_v40 }
 0x15a   :  { %v192_v44 = vmax.f32 %v184_v43, 0.0  ;;  %319 = vmatpush3.msra.mxu1 %v193_v42 }
 0x15b   :  { %320 = vmatprep.subr.mxu1 %v354_v36 }
 0x15c   :  { %321 = vmatpush3.msra.mxu1 %v192_v44 }
 0x15d   :  { %323 = vmatmul.mubr.msk.f32.vlgmr.msra.gmra.mxu1 %vm205_vm2, %v194_v45 }
 0x21d   :  { %v275_v51 = vpop.f32.mrf.mxu1 }
 0x21e   :  { %v276_v52 = vadd.f32 %v275_v51, %v204_v50 }
 0x21f   :  { %v324_v53 = vpop.f32.mrf.mxu1 }
 0x220   :  { %279 = vst [vmem:[#allocation3] sm:$0x1] %v276_v52 }
 0x221   :  { %342 = shalt.err (!%p339_p4)
}
 0x222   :  { %289 = dma.vmem_to_hbm [thread:$0]  %s287_s26, 16, %s454_s7, [#allocation4]  }
 0x223   :  { %351 = dma.done.wait [#allocation4], 16  }
 0x224   :  { %352 = vsyncadd [#allocation4], 4294967280 }
 0x225   :  { %293 = vsyncpa [#allocation4], 1 }

</bundles_post_ra>
